<compile_context>
chip_gen: v7x
topology: tpu7x:2x2x1
jax: 0.10.0
libtpu: 0.0.40
codegen_flags: <defaults>
</compile_context>

<pallas_src>
import jax
import jax.numpy as jnp
from jax.experimental import pallas as pl
from jax.experimental.pallas import tpu as pltpu


def se_block_kernel(x_ref, w1_ref, w2_ref, o_ref):
    """Fused SEBlock forward for one batch tile.

    x_ref : (bt, C, L)  activations, all spatial dims flattened into L
    w1_ref: (C, H)      layer1 Linear weight, pre-transposed (H = C // ratio)
    w2_ref: (H, C)      layer2 Linear weight, pre-transposed
    o_ref : (bt, C, L)
    """
    xb = x_ref[...]
    # Squeeze: global average over the flattened spatial (lane) axis, in f32.
    m = jnp.mean(xb.astype(jnp.float32), axis=-1)                       # (bt, C)
    # Excitation MLP: batch tile is the MXU M dimension; f32 accumulation.
    s = jnp.maximum(
        jnp.dot(m, w1_ref[...].astype(jnp.float32),
                preferred_element_type=jnp.float32), 0.0)               # (bt, H)
    g = jax.nn.sigmoid(
        jnp.dot(s, w2_ref[...].astype(jnp.float32),
                preferred_element_type=jnp.float32))                    # (bt, C)
    # Scale: per-(batch, channel) gate broadcast over the spatial axis.
    o_ref[...] = xb * g.astype(xb.dtype)[:, :, None]


def se_block(x, w1, w2, *, vmem_block_budget_bytes=2 << 20):
    """SEBlock forward.

    x : (B, C, *spatial)  any number (>=1) of trailing spatial dims
    w1: (C // ratio, C)   PyTorch layer1 Linear weight (bias=False)
    w2: (C, C // ratio)   PyTorch layer2 Linear weight (bias=False)
    """
    B, C = x.shape[0], x.shape[1]
    L = 1
    for d in x.shape[2:]:
        L *= d
    H = w1.shape[0]
    x3 = x.reshape(B, C, L)  # flatten spatial dims -> lane-dense last axis

    # Largest batch-tile size (divisor of B) whose block fits the VMEM budget.
    bytes_per_sample = C * L * x.dtype.itemsize
    bt = 1
    for d in range(1, B + 1):
        if B % d == 0 and d * bytes_per_sample <= vmem_block_budget_bytes:
            bt = d
    grid = (B // bt,)

    out = pl.pallas_call(
        se_block_kernel,
        out_shape=jax.ShapeDtypeStruct((B, C, L), x.dtype),
        grid=grid,
        in_specs=[
            pl.BlockSpec((bt, C, L), lambda i: (i, 0, 0)),
            pl.BlockSpec((C, H), lambda i: (0, 0)),   # resident (constant idx)
            pl.BlockSpec((H, C), lambda i: (0, 0)),   # resident (constant idx)
        ],
        out_specs=pl.BlockSpec((bt, C, L), lambda i: (i, 0, 0)),
        compiler_params=pltpu.CompilerParams(
            dimension_semantics=("parallel",)),
    )(x3, w1.T, w2.T)  # pre-transpose tiny weights -> row-major MXU matmuls
    return out.reshape(x.shape)


# ---------------------------------------------------------------------------
# Pure-JAX reference (mirrors the PyTorch module exactly).
# ---------------------------------------------------------------------------
def se_block_ref(x, w1, w2):
    axes = tuple(range(2, x.ndim))
    m = jnp.mean(x, axis=axes)
    s = jnp.maximum(jnp.dot(m, w1.T, precision=jax.lax.Precision.HIGHEST), 0.0)
    g = jax.nn.sigmoid(jnp.dot(s, w2.T, precision=jax.lax.Precision.HIGHEST))
    g = g.reshape(g.shape + (1,) * (x.ndim - 2))
    return x * g


# ---------------------------------------------------------------------------
if __name__ == "__main__":
    key = jax.random.PRNGKey(0)
    k1, k2, k3, k4, k5, k6 = jax.random.split(key, 6)

    # Case 1: Conv1d-style activations (B, C, L) -- the layout SEBlock sees in
    # multi_resolution_net (channels = emb_base_size = 128, ratio = 16).
    B, C, L, ratio = 2, 128, 256, 16
    Hd = C // ratio
    x = jax.random.normal(k1, (B, C, L), jnp.float32)
    w1 = jax.random.normal(k2, (Hd, C), jnp.float32) / jnp.sqrt(jnp.float32(C))
    w2 = jax.random.normal(k3, (C, Hd), jnp.float32) / jnp.sqrt(jnp.float32(Hd))

    out = jax.block_until_ready(jax.jit(se_block)(x, w1, w2))
    assert out.shape == x.shape
    ref = jax.block_until_ready(se_block_ref(x, w1, w2))
    err = float(jnp.max(jnp.abs(out - ref)))
    assert err < 2e-2, f"case 1 max abs err {err}"

    # Case 2: generic ND spatial input (B, C, H, W) -- SEBlock is rank-agnostic;
    # the wrapper flattens spatial dims so the same kernel handles it.
    B2, C2, r2 = 2, 64, 16
    H2 = C2 // r2
    x2 = jax.random.normal(k4, (B2, C2, 16, 16), jnp.float32)
    w1b = jax.random.normal(k5, (H2, C2), jnp.float32) / jnp.sqrt(jnp.float32(C2))
    w2b = jax.random.normal(k6, (C2, H2), jnp.float32) / jnp.sqrt(jnp.float32(H2))

    out2 = jax.block_until_ready(jax.jit(se_block)(x2, w1b, w2b))
    assert out2.shape == x2.shape
    ref2 = jax.block_until_ready(se_block_ref(x2, w1b, w2b))
    err2 = float(jnp.max(jnp.abs(out2 - ref2)))
    assert err2 < 2e-2, f"case 2 max abs err {err2}"

    print("KERNEL_OK")
</pallas_src>

<mosaic_0001>
module attributes {stable_mosaic.version = 11 : i64} {
  func.func @se_block_kernel(%arg0: i32, %arg1: memref<2x128x256xf32, #tpu.memory_space<vmem>>, %arg2: memref<128x8xf32, #tpu.memory_space<vmem>>, %arg3: memref<8x128xf32, #tpu.memory_space<vmem>>, %arg4: memref<2x128x256xf32, #tpu.memory_space<vmem>>) attributes {dimension_semantics = [#tpu.dimension_semantics<parallel>], iteration_bounds = array<i64: 1>, scalar_prefetch = 0 : i64, scratch_operands = 0 : i64, tpu.core_type = #tpu.core_type<tc>, window_params = [{transform_indices = @transform_0, window_bounds = array<i64: 2, 128, 256>}, {pipeline_mode = #tpu.pipeline_mode<synchronous>, transform_indices = @transform_1, window_bounds = array<i64: 128, 8>}, {pipeline_mode = #tpu.pipeline_mode<synchronous>, transform_indices = @transform_2, window_bounds = array<i64: 8, 128>}, {transform_indices = @transform_3, window_bounds = array<i64: 2, 128, 256>}]} {
    %c0 = arith.constant 0 : index
    %c0_0 = arith.constant 0 : index
    %c0_1 = arith.constant 0 : index
    %0 = vector.load %arg1[%c0, %c0_0, %c0_1] : memref<2x128x256xf32, #tpu.memory_space<vmem>>, vector<2x128x256xf32>
    %cst = arith.constant dense<0.000000e+00> : vector<2x128xf32>
    %1 = vector.multi_reduction <add>, %0, %cst [2] : vector<2x128x256xf32> to vector<2x128xf32>
    %cst_2 = arith.constant 2.560000e+02 : f32
    %2 = vector.broadcast %cst_2 : f32 to vector<2x128xf32>
    %3 = arith.divf %1, %2 : vector<2x128xf32>
    %c0_3 = arith.constant 0 : index
    %c0_4 = arith.constant 0 : index
    %4 = vector.load %arg2[%c0_3, %c0_4] : memref<128x8xf32, #tpu.memory_space<vmem>>, vector<128x8xf32>
    %cst_5 = arith.constant dense<0.000000e+00> : vector<2x8xf32>
    %5 = tpu.matmul %3, %4, %cst_5 {dimension_numbers = #tpu.dot_dimension_numbers<[1], [0], [0], [1], [0, 0, 1, 1], [], []>} : vector<2x128xf32>, vector<128x8xf32>, vector<2x8xf32> -> vector<2x8xf32>
    %cst_6 = arith.constant 0.000000e+00 : f32
    %6 = vector.broadcast %cst_6 : f32 to vector<2x8xf32>
    %7 = arith.maximumf %5, %6 : vector<2x8xf32>
    %c0_7 = arith.constant 0 : index
    %c0_8 = arith.constant 0 : index
    %8 = vector.load %arg3[%c0_7, %c0_8] : memref<8x128xf32, #tpu.memory_space<vmem>>, vector<8x128xf32>
    %cst_9 = arith.constant dense<0.000000e+00> : vector<2x128xf32>
    %9 = tpu.matmul %7, %8, %cst_9 {dimension_numbers = #tpu.dot_dimension_numbers<[1], [0], [0], [1], [0, 0, 1, 1], [], []>} : vector<2x8xf32>, vector<8x128xf32>, vector<2x128xf32> -> vector<2x128xf32>
    %10 = arith.negf %9 : vector<2x128xf32>
    %11 = math.exp %10 : vector<2x128xf32>
    %cst_10 = arith.constant 1.000000e+00 : f32
    %12 = vector.broadcast %cst_10 : f32 to vector<2x128xf32>
    %13 = arith.addf %12, %11 : vector<2x128xf32>
    %14 = arith.divf %12, %13 : vector<2x128xf32>
    %15 = vector.shape_cast %14 : vector<2x128xf32> to vector<2x128x1xf32>
    %16 = vector.broadcast %15 : vector<2x128x1xf32> to vector<2x128x256xf32>
    %17 = arith.mulf %0, %16 : vector<2x128x256xf32>
    %c0_11 = arith.constant 0 : index
    %c0_12 = arith.constant 0 : index
    %c0_13 = arith.constant 0 : index
    %18 = vector.load %arg4[%c0_11, %c0_12, %c0_13] : memref<2x128x256xf32, #tpu.memory_space<vmem>>, vector<2x128x256xf32>
    tpu.vector_store %arg4[%c0_11, %c0_12, %c0_13], %17 {strides = array<i32>} : memref<2x128x256xf32, #tpu.memory_space<vmem>>, vector<2x128x256xf32>,
    return
  }
  func.func @transform_0(%arg0: i32) -> (i32, i32, i32) {
    %c0_i32 = arith.constant 0 : i32
    %c0_i32_0 = arith.constant 0 : i32
    %c0_i32_1 = arith.constant 0 : i32
    return %arg0, %c0_i32, %c0_i32_0 : i32, i32, i32
  }
  func.func @transform_1(%arg0: i32) -> (i32, i32) {
    %c0_i32 = arith.constant 0 : i32
    %c0_i32_0 = arith.constant 0 : i32
    %c0_i32_1 = arith.constant 0 : i32
    return %c0_i32, %c0_i32_0 : i32, i32
  }
  func.func @transform_2(%arg0: i32) -> (i32, i32) {
    %c0_i32 = arith.constant 0 : i32
    %c0_i32_0 = arith.constant 0 : i32
    %c0_i32_1 = arith.constant 0 : i32
    return %c0_i32, %c0_i32_0 : i32, i32
  }
  func.func @transform_3(%arg0: i32) -> (i32, i32, i32) {
    %c0_i32 = arith.constant 0 : i32
    %c0_i32_0 = arith.constant 0 : i32
    %c0_i32_1 = arith.constant 0 : i32
    return %arg0, %c0_i32, %c0_i32_0 : i32, i32, i32
  }
}

</mosaic_0001>

<bundles_post_ra>
// kernel: se_block.1
= control target key start
LH: loop header
LB: loop body
LE: loop exit
PB: predicated region body
PF: predicated region fallthrough
CT: control target
= control target key end

     0   :  { %8 = vsyncpa [#allocation3], 0  ;;  %s1537_s0 = inlined_call_operand.hbm [shape: f32[2,128,256], index: 0, kind: input, shape index: {}]   ;;  %s1538_s1 = inlined_call_operand.vmem [shape: f32[128,8], index: 1, kind: input, shape index: {}]   ;;  %s1539_s2 = inlined_call_operand.vmem [shape: f32[8,128], index: 2, kind: input, shape index: {}]   ;;  %s1540_s3 = inlined_call_operand.hbm [shape: f32[2,128,256], index: 3, kind: output, shape index: {}]  }
   0x1   :  { %9 = vsyncpa [#allocation4], 0  ;;  %s1038_s12 = smov [#allocation2]   ;;  %s990_s16 = scalar_lea.hbm %s1537_s0, 8192 }
   0x2   :  { %s15_s13 = sshll.u32 %s1038_s12, 4  ;;  %p991_p0 = scmp.ne.s32.totalorder %s1537_s0, %s990_s16  ;;  %s16_s13 = int_to_ptr.vmem [resolvable:$true] %s15_s13 }
   0x3   :  { %p994_p1 = scmp.lt.u32.totalorder %s990_s16, %s1537_s0 }
   0x5   :  { %p996_p2 = pnand %p994_p1, %p991_p0 }
   0x7   :  { %999 = shalt.err (!%p996_p2)
}
   0x8   :  { %s1000_s21 = scalar_lea.vmem %s16_s13, 8192  ;;  %p1005_p4 = scmp.lt.s32.totalorder %s16_s13, %s16_s13 }
   0x9   :  { %p1001_p3 = scmp.ne.s32.totalorder %s16_s13, %s1000_s21  ;;  %p1006_p5 = scmp.lt.s32.totalorder %s1000_s21, %s1000_s21 }
   0xb   :  { %p1007_p6 = por %p1006_p5, %p1005_p4 }
   0xd   :  { %p1008_p7 = pnand %p1007_p6, %p1001_p3 }
   0xf   :  { %1011 = shalt.err (!%p1008_p7)
}
  0x10   :  { %s1039_s22 = smov 256   ;;  %s1040_s23 = smov 16  }
  0x11   :  { %21 = dma.hbm_to_vmem [thread:$0]  %s1537_s0, 8192, %s16_s13, [#allocation3], %s1039_s22, %s1039_s22, %s1040_s23  }
  0x12   :  { %1034 = dma.done.wait [#allocation3], 8192  }
  0x13   :  { %1035 = vsyncadd [#allocation3], 4294959104  ;;  %v1080_v0 = vld [vmem:[#allocation2 + $0x100] sm:$0xff]  ;;  %v1082_v1 = vld [vmem:[#allocation2 + $0x108] sm:$0xff]  ;;  %vm1042_vm0 = vmmov 0   ;;  %vm281_vm1 = vcmask 130112  }
  0x14   :  { %1593 = vst [vmem:[#allocation8_spill] sm:$0xff] %v1080_v0  ;;  %1594 = vst [vmem:[#allocation9_spill] sm:$0xff] %v1082_v1  ;;  %v1084_v2 = vld [vmem:[#allocation2] sm:$0xff]  ;;  %v141_v3 = vadd.f32 %v1082_v1, %v1080_v0  ;;  %v1088_v4 = vld [vmem:[#allocation2 + $0x8] sm:$0xff]  ;;  %vm288_vm2 = vcmask 195712   ;;  %vm295_vm3 = vcmask 261312  }
  0x15   :  { %v1090_v5 = vld [vmem:[#allocation2 + $0x110] sm:$0xff]  ;;  %v1092_v6 = vld [vmem:[#allocation2 + $0x118] sm:$0xff]  ;;  %v93_v7 = vadd.f32 %v1088_v4, %v1084_v2  ;;  %v1104_v12 = vld [vmem:[#allocation2 + $0x120] sm:$0xff]  ;;  %vm302_vm4 = vcmask 326912   ;;  %vm309_vm5 = vcmask 392512   ;;  %vm316_vm6 = vcmask 458112  }
  0x16   :  { %1595 = vst [vmem:[#allocation10_spill] sm:$0xff] %v1090_v5  ;;  %1596 = vst [vmem:[#allocation11_spill] sm:$0xff] %v1092_v6  ;;  %v1096_v8 = vld [vmem:[#allocation2 + $0x10] sm:$0xff]  ;;  %v1098_v9 = vld [vmem:[#allocation2 + $0x18] sm:$0xff]  ;;  %142 = vadd.xlane.f32.xlu1 %v141_v3  ;;  %v144_v10 = vadd.f32 %v1092_v6, %v1090_v5  ;;  %vm323_vm7 = vcmask 523712   ;;  %vm330_vm8 = vcmask 589312  }
  0x17   :  { %94 = vadd.xlane.f32.xlu0 %v93_v7  ;;  %v96_v11 = vadd.f32 %v1098_v9, %v1096_v8  ;;  %1597 = vst [vmem:[#allocation12_spill] sm:$0xff] %v1104_v12  ;;  %v1106_v13 = vld [vmem:[#allocation2 + $0x128] sm:$0xff]  ;;  %v1108_v14 = vld [vmem:[#allocation2 + $0x20] sm:$0xff]  ;;  %v1116_v18 = vld [vmem:[#allocation2 + $0x130] sm:$0xff]  ;;  %vm337_vm9 = vcmask 654912   ;;  %vm344_vm10 = vcmask 720512  }
  0x18   :  { %1598 = vst [vmem:[#allocation13_spill] sm:$0xff] %v1106_v13  ;;  %v1110_v15 = vld [vmem:[#allocation2 + $0x28] sm:$0xff]  ;;  %v147_v16 = vadd.f32 %v1106_v13, %v1104_v12  ;;  %1599 = vst [vmem:[#allocation14_spill] sm:$0xff] %v1116_v18  ;;  %v1118_v19 = vld [vmem:[#allocation2 + $0x138] sm:$0xff]  ;;  %vm351_vm11 = vcmask 786112   ;;  %vm358_vm12 = vcmask 851712  }
  0x19   :  { %v99_v17 = vadd.f32 %v1110_v15, %v1108_v14  ;;  %1600 = vst [vmem:[#allocation15_spill] sm:$0xff] %v1118_v19  ;;  %v1120_v20 = vld [vmem:[#allocation2 + $0x30] sm:$0xff]  ;;  %v1122_v21 = vld [vmem:[#allocation2 + $0x38] sm:$0xff]  ;;  %v150_v22 = vadd.f32 %v1118_v19, %v1116_v18  ;;  %v1128_v24 = vld [vmem:[#allocation2 + $0x140] sm:$0xff]  ;;  %vm365_vm13 = vcmask 917312   ;;  %vm372_vm14 = vcmask 982912  }
  0x1a   :  { %145 = vadd.xlane.f32.xlu1 %v144_v10  ;;  %v102_v23 = vadd.f32 %v1122_v21, %v1120_v20  ;;  %1601 = vst [vmem:[#allocation16_spill] sm:$0xff] %v1128_v24  ;;  %v1130_v25 = vld [vmem:[#allocation2 + $0x148] sm:$0xff]  ;;  %v1132_v26 = vld [vmem:[#allocation2 + $0x40] sm:$0xff]  ;;  %v1140_v30 = vld [vmem:[#allocation2 + $0x150] sm:$0xff]  ;;  %vm379_vm15 = vcmask 1048512  }
  0x1b   :  { %97 = vadd.xlane.f32.xlu0 %v96_v11  ;;  %1602 = vst [vmem:[#allocation17_spill] sm:$0xff] %v1130_v25  ;;  %v1134_v27 = vld [vmem:[#allocation2 + $0x48] sm:$0xff]  ;;  %v153_v28 = vadd.f32 %v1130_v25, %v1128_v24  ;;  %1603 = vst [vmem:[#allocation18_spill] sm:$0xff] %v1140_v30  ;;  %v1142_v31 = vld [vmem:[#allocation2 + $0x158] sm:$0xff] }
  0x1c   :  { %v105_v29 = vadd.f32 %v1134_v27, %v1132_v26  ;;  %1604 = vst [vmem:[#allocation19_spill] sm:$0xff] %v1142_v31  ;;  %v1144_v32 = vld [vmem:[#allocation2 + $0x50] sm:$0xff]  ;;  %v1146_v33 = vld [vmem:[#allocation2 + $0x58] sm:$0xff]  ;;  %v156_v34 = vadd.f32 %v1142_v31, %v1140_v30  ;;  %v1152_v36 = vld [vmem:[#allocation2 + $0x160] sm:$0xff] }
  0x1d   :  { %1605 = vst [vmem:[#allocation20_spill] sm:$0xff] %v1144_v32  ;;  %1606 = vst [vmem:[#allocation21_spill] sm:$0xff] %v1146_v33  ;;  %v108_v35 = vadd.f32 %v1146_v33, %v1144_v32  ;;  %v1154_v37 = vld [vmem:[#allocation2 + $0x168] sm:$0xff]  ;;  %v1156_v38 = vld [vmem:[#allocation2 + $0x60] sm:$0xff] }
  0x1e   :  { %148 = vadd.xlane.f32.xlu1 %v147_v16  ;;  %1607 = vst [vmem:[#allocation22_spill] sm:$0xff] %v1152_v36  ;;  %1608 = vst [vmem:[#allocation23_spill] sm:$0xff] %v1154_v37  ;;  %v1158_v39 = vld [vmem:[#allocation2 + $0x68] sm:$0xff]  ;;  %v159_v40 = vadd.f32 %v1154_v37, %v1152_v36  ;;  %v1164_v42 = vld [vmem:[#allocation2 + $0x170] sm:$0xff] }
  0x1f   :  { %100 = vadd.xlane.f32.xlu0 %v99_v17  ;;  %v111_v41 = vadd.f32 %v1158_v39, %v1156_v38  ;;  %1609 = vst [vmem:[#allocation24_spill] sm:$0xff] %v1164_v42  ;;  %v1166_v43 = vld [vmem:[#allocation2 + $0x178] sm:$0xff]  ;;  %v1168_v44 = vld [vmem:[#allocation2 + $0x70] sm:$0xff]  ;;  %v1176_v48 = vld [vmem:[#allocation2 + $0x180] sm:$0xff] }
  0x20   :  { %1610 = vst [vmem:[#allocation25_spill] sm:$0xff] %v1166_v43  ;;  %1611 = vst [vmem:[#allocation26_spill] sm:$0xff] %v1168_v44  ;;  %v1170_v45 = vld [vmem:[#allocation2 + $0x78] sm:$0xff]  ;;  %v162_v46 = vadd.f32 %v1166_v43, %v1164_v42  ;;  %v1178_v49 = vld [vmem:[#allocation2 + $0x188] sm:$0xff] }
  0x21   :  { %1612 = vst [vmem:[#allocation27_spill] sm:$0xff] %v1170_v45  ;;  %v114_v47 = vadd.f32 %v1170_v45, %v1168_v44  ;;  %1613 = vst [vmem:[#allocation28_spill] sm:$0xff] %v1176_v48  ;;  %v1180_v50 = vld [vmem:[#allocation2 + $0x80] sm:$0xff]  ;;  %v1182_v51 = vld [vmem:[#allocation2 + $0x88] sm:$0xff]  ;;  %v165_v52 = vadd.f32 %v1178_v49, %v1176_v48 }
  0x22   :  { %151 = vadd.xlane.f32.xlu1 %v150_v22  ;;  %1614 = vst [vmem:[#allocation29_spill] sm:$0xff] %v1178_v49  ;;  %1615 = vst [vmem:[#allocation30_spill] sm:$0xff] %v1180_v50  ;;  %v117_v53 = vadd.f32 %v1182_v51, %v1180_v50  ;;  %v1188_v54 = vld [vmem:[#allocation2 + $0x190] sm:$0xff]  ;;  %v1190_v55 = vld [vmem:[#allocation2 + $0x198] sm:$0xff] }
  0x23   :  { %103 = vadd.xlane.f32.xlu0 %v102_v23  ;;  %1616 = vst [vmem:[#allocation31_spill] sm:$0xff] %v1182_v51  ;;  %1617 = vst [vmem:[#allocation32_spill] sm:$0xff] %v1188_v54  ;;  %v1192_v56 = vld [vmem:[#allocation2 + $0x90] sm:$0xff]  ;;  %v1194_v57 = vld [vmem:[#allocation2 + $0x98] sm:$0xff]  ;;  %v168_v58 = vadd.f32 %v1190_v55, %v1188_v54 }
  0x24   :  { %1618 = vst [vmem:[#allocation33_spill] sm:$0xff] %v1190_v55  ;;  %1619 = vst [vmem:[#allocation34_spill] sm:$0xff] %v1192_v56  ;;  %v120_v59 = vadd.f32 %v1194_v57, %v1192_v56  ;;  %v1200_v60 = vld [vmem:[#allocation2 + $0x1a0] sm:$0xff]  ;;  %v1202_v61 = vld [vmem:[#allocation2 + $0x1a8] sm:$0xff] }
  0x25   :  { %1620 = vst [vmem:[#allocation35_spill] sm:$0xff] %v1194_v57  ;;  %1621 = vst [vmem:[#allocation36_spill] sm:$0xff] %v1200_v60  ;;  %v1204_v62 = vld [vmem:[#allocation2 + $0xa0] sm:$0xff]  ;;  %v1206_v63 = vld [vmem:[#allocation2 + $0xa8] sm:$0xff]  ;;  %v171_v3 = vadd.f32 %v1202_v61, %v1200_v60 }
  0x26   :  { %154 = vadd.xlane.f32.xlu1 %v153_v28  ;;  %1622 = vst [vmem:[#allocation37_spill] sm:$0xff] %v1202_v61  ;;  %1623 = vst [vmem:[#allocation38_spill] sm:$0xff] %v1204_v62  ;;  %v123_v7 = vadd.f32 %v1206_v63, %v1204_v62  ;;  %v1212_v10 = vld [vmem:[#allocation2 + $0x1b0] sm:$0xff]  ;;  %v1214_v11 = vld [vmem:[#allocation2 + $0x1b8] sm:$0xff] }
  0x27   :  { %106 = vadd.xlane.f32.xlu0 %v105_v29  ;;  %1624 = vst [vmem:[#allocation39_spill] sm:$0xff] %v1206_v63  ;;  %1625 = vst [vmem:[#allocation40_spill] sm:$0xff] %v1212_v10  ;;  %v1216_v16 = vld [vmem:[#allocation2 + $0xb0] sm:$0xff]  ;;  %v1218_v17 = vld [vmem:[#allocation2 + $0xb8] sm:$0xff]  ;;  %v174_v22 = vadd.f32 %v1214_v11, %v1212_v10  ;;  %v1041_v10 = vmov 0.0|0.0  }
  0x28   :  { %1626 = vst [vmem:[#allocation41_spill] sm:$0xff] %v1214_v11  ;;  %1627 = vst [vmem:[#allocation42_spill] sm:$0xff] %v1216_v16  ;;  %v126_v23 = vadd.f32 %v1218_v17, %v1216_v16  ;;  %v1224_v28 = vld [vmem:[#allocation2 + $0x1c0] sm:$0xff]  ;;  %v1226_v29 = vld [vmem:[#allocation2 + $0x1c8] sm:$0xff]  ;;  %955 = vmatprep.subr.bf16.mxu0 %v1041_v10 }
  0x29   :  { %1628 = vst [vmem:[#allocation43_spill] sm:$0xff] %v1218_v17  ;;  %1629 = vst [vmem:[#allocation44_spill] sm:$0xff] %v1224_v28  ;;  %v1256_v11 = vld [vmem:[#allocation2 + $0x1e8] sm:$0xff]  ;;  %v1276_v55 = vld [vmem:[#allocation2 + $0xf0] sm:$0xff] }
  0x2a   :  { %157 = vadd.xlane.f32.xlu1 %v156_v34  ;;  %1630 = vst [vmem:[#allocation45_spill] sm:$0xff] %v1226_v29  ;;  %v1228_v34 = vld [vmem:[#allocation2 + $0xc0] sm:$0xff]  ;;  %1638 = vst [vmem:[#allocation53_spill] sm:$0xff] %v1256_v11  ;;  %v1278_v54 = vld [vmem:[#allocation2 + $0xf8] sm:$0xff] }
  0x2b   :  { %109 = vadd.xlane.f32.xlu0 %v108_v35  ;;  %1631 = vst [vmem:[#allocation46_spill] sm:$0xff] %v1228_v34  ;;  %v1230_v35 = vld [vmem:[#allocation2 + $0xc8] sm:$0xff]  ;;  %1643 = vst [vmem:[#allocation58_spill] sm:$0xff] %v1276_v55 }
  0x2c   :  { %1632 = vst [vmem:[#allocation47_spill] sm:$0xff] %v1230_v35  ;;  %1644 = vst [vmem:[#allocation59_spill] sm:$0xff] %v1278_v54 }
  0x2e   :  { %160 = vadd.xlane.f32.xlu1 %v159_v40  ;;  %v177_v40 = vadd.f32 %v1226_v29, %v1224_v28  ;;  %v1258_v29 = vld [vmem:[#allocation2 + $0xe0] sm:$0xff]  ;;  %v1260_v28 = vld [vmem:[#allocation2 + $0xe8] sm:$0xff] }
  0x2f   :  { %112 = vadd.xlane.f32.xlu0 %v111_v41  ;;  %v129_v41 = vadd.f32 %v1230_v35, %v1228_v34  ;;  %1639 = vst [vmem:[#allocation54_spill] sm:$0xff] %v1258_v29  ;;  %1640 = vst [vmem:[#allocation55_spill] sm:$0xff] %v1260_v28 }
  0x32   :  { %163 = vadd.xlane.f32.xlu1 %v162_v46  ;;  %v1236_v46 = vld [vmem:[#allocation2 + $0x1d0] sm:$0xff] }
  0x33   :  { %115 = vadd.xlane.f32.xlu0 %v114_v47  ;;  %1633 = vst [vmem:[#allocation48_spill] sm:$0xff] %v1236_v46  ;;  %v1238_v47 = vld [vmem:[#allocation2 + $0x1d8] sm:$0xff] }
  0x34   :  { %1634 = vst [vmem:[#allocation49_spill] sm:$0xff] %v1238_v47 }
  0x36   :  { %166 = vadd.xlane.f32.xlu1 %v165_v52  ;;  %v1240_v52 = vld [vmem:[#allocation2 + $0xd0] sm:$0xff] }
  0x37   :  { %118 = vadd.xlane.f32.xlu0 %v117_v53  ;;  %1635 = vst [vmem:[#allocation50_spill] sm:$0xff] %v1240_v52  ;;  %v1242_v53 = vld [vmem:[#allocation2 + $0xd8] sm:$0xff] }
  0x38   :  { %1636 = vst [vmem:[#allocation51_spill] sm:$0xff] %v1242_v53 }
  0x3a   :  { %169 = vadd.xlane.f32.xlu1 %v168_v58  ;;  %v222_v58 = vld [vmem:[%s1538_s1] sm:$0xff] }
  0x3b   :  { %121 = vadd.xlane.f32.xlu0 %v120_v59  ;;  %v223_v59 = vld [vmem:[%s1538_s1 + $0x8] sm:$0xff] }
  0x3e   :  { %172 = vadd.xlane.f32.xlu1 %v171_v3  ;;  %v180_v3 = vadd.f32 %v1238_v47, %v1236_v46  ;;  %v135_v47 = vadd.f32 %v1260_v28, %v1258_v29  ;;  %v1272_v46 = vld [vmem:[#allocation2 + $0x1f0] sm:$0xff] }
  0x3f   :  { %124 = vadd.xlane.f32.xlu0 %v123_v7  ;;  %v956_v7 = vpack.c.bf16 %v223_v59, %v222_v58  ;;  %1641 = vst [vmem:[#allocation56_spill] sm:$0xff] %v1272_v46 }
  0x41   :  { %957 = vmatpush3.bf16.msra.mxu0 %v956_v7  ;;  %v1274_v7 = vld [vmem:[#allocation2 + $0x1f8] sm:$0xff] }
  0x42   :  { %175 = vadd.xlane.f32.xlu1 %v174_v22  ;;  %v132_v22 = vadd.f32 %v1242_v53, %v1240_v52  ;;  %958 = vmatprep.subr.bf16.mxu0 %v1041_v10  ;;  %1642 = vst [vmem:[#allocation57_spill] sm:$0xff] %v1274_v7 }
  0x43   :  { %127 = vadd.xlane.f32.xlu0 %v126_v23  ;;  %v1254_v23 = vld [vmem:[#allocation2 + $0x1e0] sm:$0xff] }
  0x44   :  { %1637 = vst [vmem:[#allocation52_spill] sm:$0xff] %v1254_v23  ;;  %v183_v58 = vadd.f32 %v1256_v11, %v1254_v23  ;;  %v138_v11 = vadd.f32 %v1278_v54, %v1276_v55  ;;  %v229_v23 = vld [vmem:[%s1538_s1 + $0x38] sm:$0xff] }
  0x46   :  { %178 = vadd.xlane.f32.xlu1 %v177_v40  ;;  %v224_v40 = vld [vmem:[%s1538_s1 + $0x10] sm:$0xff] }
  0x47   :  { %130 = vadd.xlane.f32.xlu0 %v129_v41  ;;  %v225_v41 = vld [vmem:[%s1538_s1 + $0x18] sm:$0xff] }
  0x48   :  { %v959_v59 = vpack.c.bf16 %v225_v41, %v224_v40  ;;  %v186_v40 = vadd.f32 %v1274_v7, %v1272_v46 }
  0x4a   :  { %181 = vadd.xlane.f32.xlu1 %v180_v3  ;;  %960 = vmatpush3.bf16.msra.mxu0 %v959_v59  ;;  %v226_v3 = vld [vmem:[%s1538_s1 + $0x20] sm:$0xff]  ;;  %v228_v59 = vld [vmem:[%s1538_s1 + $0x30] sm:$0xff] }
  0x4b   :  { %133 = vadd.xlane.f32.xlu0 %v132_v22  ;;  %961 = vmatprep.subr.bf16.mxu0 %v1041_v10  ;;  %v227_v22 = vld [vmem:[%s1538_s1 + $0x28] sm:$0xff] }
  0x4c   :  { %v962_v41 = vpack.c.bf16 %v227_v22, %v226_v3  ;;  %v231_v3 = vld [vmem:[%s1538_s1 + $0x48] sm:$0xff] }
  0x4e   :  { %184 = vadd.xlane.f32.xlu1 %v183_v58  ;;  %963 = vmatpush3.bf16.msra.mxu0 %v962_v41  ;;  %v965_v58 = vpack.c.bf16 %v229_v23, %v228_v59  ;;  %v232_v41 = vld [vmem:[%s1538_s1 + $0x50] sm:$0xff]  ;;  %v235_v59 = vld [vmem:[%s1538_s1 + $0x68] sm:$0xff] }
  0x4f   :  { %136 = vadd.xlane.f32.xlu0 %v135_v47  ;;  %964 = vmatprep.subr.bf16.mxu0 %v1041_v10  ;;  %v230_v47 = vld [vmem:[%s1538_s1 + $0x40] sm:$0xff] }
  0x50   :  { %v968_v22 = vpack.c.bf16 %v231_v3, %v230_v47  ;;  %v236_v47 = vld [vmem:[%s1538_s1 + $0x70] sm:$0xff]  ;;  %v237_v3 = vld [vmem:[%s1538_s1 + $0x78] sm:$0xff] }
  0x52   :  { %187 = vadd.xlane.f32.xlu1 %v186_v40  ;;  %966 = vmatpush3.bf16.msra.mxu0 %v965_v58  ;;  %v234_v40 = vld [vmem:[%s1538_s1 + $0x60] sm:$0xff] }
  0x53   :  { %139 = vadd.xlane.f32.xlu0 %v138_v11  ;;  %967 = vmatprep.subr.bf16.mxu0 %v1041_v10  ;;  %v233_v11 = vld [vmem:[%s1538_s1 + $0x58] sm:$0xff]  ;;  %v974_v58 = vpack.c.bf16 %v235_v59, %v234_v40 }
  0x54   :  { %v971_v23 = vpack.c.bf16 %v233_v11, %v232_v41  ;;  %v1043_v41 = vmov 0.0  }
  0x55   :  { %947 = vmatprep.mubr.msk.f32.mxu0 %vm1042_vm0, %v1043_v41  ;;  %950 = vmatprep.subr.mxu1 %v1043_v41 }
  0x56   :  { %969 = vmatpush3.bf16.msra.mxu0 %v968_v22  ;;  %v977_v22 = vpack.c.bf16 %v237_v3, %v236_v47  ;;  %952 = vmatprep.mubr.msk.f32.mxu1 %vm1042_vm0, %v1043_v41  ;;  %vm460_vm0 = vcmask 1041409  }
  0x57   :  { %970 = vmatprep.subr.bf16.mxu0 %v1041_v10 }
  0x5a   :  { %972 = vmatpush3.bf16.msra.mxu0 %v971_v23 }
  0x5b   :  { %973 = vmatprep.subr.bf16.mxu0 %v1041_v10 }
  0x5e   :  { %975 = vmatpush3.bf16.msra.mxu0 %v974_v58 }
  0x5f   :  { %976 = vmatprep.subr.bf16.mxu0 %v1041_v10 }
  0x62   :  { %978 = vmatpush3.bf16.msra.mxu0 %v977_v22  ;;  %v270_v22 = vlaneseq }
  0x64   :  { %v271_v48 = vand.u32 127, %v270_v22  ;;  %v1330_v31 = vshrl.u32 %v270_v22, 7 }
  0x66   :  { %v276_v30 = vadd.s32 4294967288, %v271_v48  ;;  %v283_v37 = vadd.s32 4294967280, %v271_v48  ;;  %v290_v19 = vadd.s32 4294967272, %v271_v48  ;;  %v297_v18 = vadd.s32 4294967264, %v271_v48 }
  0x67   :  { %v304_v24 = vadd.s32 4294967256, %v271_v48  ;;  %v311_v6 = vadd.s32 4294967248, %v271_v48  ;;  %v318_v5 = vadd.s32 4294967240, %v271_v48  ;;  %v1337_v13 = vsub.s32 %v271_v48, %v1330_v31 }
  0x68   :  { %v325_v12 = vadd.s32 4294967232, %v271_v48  ;;  %v332_v54 = vadd.s32 4294967224, %v271_v48  ;;  %v339_v55 = vadd.s32 4294967216, %v271_v48  ;;  %v279_v22 = vsub.s32 %v276_v30, %v1330_v31 }
  0x69   :  { %v1341_v1 = vsub.s32 %v283_v37, %v1330_v31  ;;  %v346_v53 = vadd.s32 4294967208, %v271_v48  ;;  %v1346_v52 = vsub.s32 %v290_v19, %v1330_v31  ;;  %v1349_v28 = vsub.s32 %v297_v18, %v1330_v31 }
  0x6a   :  { %v353_v17 = vadd.s32 4294967200, %v271_v48  ;;  %v1354_v30 = vsub.s32 %v304_v24, %v1330_v31  ;;  %v1357_v37 = vsub.s32 %v311_v6, %v1330_v31  ;;  %v1360_v16 = vsub.s32 %v318_v5, %v1330_v31 }
  0x6b   :  { %v360_v35 = vadd.s32 4294967192, %v271_v48  ;;  %v1363_v19 = vsub.s32 %v325_v12, %v1330_v31  ;;  %v1366_v18 = vsub.s32 %v332_v54, %v1330_v31  ;;  %v1369_v57 = vsub.s32 %v339_v55, %v1330_v31 }
  0x6c   :  { %v1372_v63 = vsub.s32 %v346_v53, %v1330_v31  ;;  %v367_v5 = vadd.s32 4294967184, %v271_v48  ;;  %v1375_v12 = vsub.s32 %v353_v17, %v1330_v31  ;;  %v374_v53 = vadd.s32 4294967176, %v271_v48 }
  0x6d   :  { %v1378_v55 = vsub.s32 %v360_v35, %v1330_v31 }
  0x6e   :  { %v1383_v17 = vsub.s32 %v367_v5, %v1330_v31 }
  0xa3   :  { %v143_v11 = vpop.xlane.xlu1 %142 }
  0xa4   :  { %v95_v23 = vpop.xlane.xlu0 %94  ;;  %v206_v62 = vmul.f32 0.00390625, %v143_v11 }
  0xa5   :  { %v190_v54 = vmul.f32 0.00390625, %v95_v23 }
  0xa7   :  { %v146_v40 = vpop.xlane.xlu1 %145  ;;  %v275_v48 = vrot.slane %v190_v54, %v1337_v13 }
  0xa8   :  { %v98_v59 = vpop.xlane.xlu0 %97  ;;  %v207_v34 = vmul.f32 0.00390625, %v146_v40 }
  0xa9   :  { %v191_v24 = vmul.f32 0.00390625, %v98_v59 }
  0xaa   :  { %v388_v59 = vrot.slane %v207_v34, %v279_v22 }
  0xab   :  { %v149_v10 = vpop.xlane.xlu1 %148  ;;  %v280_v32 = vrot.slane %v191_v24, %v279_v22 }
  0xac   :  { %v101_v58 = vpop.xlane.xlu0 %100  ;;  %v208_v56 = vmul.f32 0.00390625, %v149_v10 }
  0xad   :  { %v192_v40 = vmul.f32 0.00390625, %v101_v58 }
  0xae   :  { %v393_v11 = vrot.slane %v208_v56, %v1341_v1 }
  0xaf   :  { %v152_v7 = vpop.xlane.xlu1 %151 }
  0xb0   :  { %v104_v46 = vpop.xlane.xlu0 %103  ;;  %v209_v45 = vmul.f32 0.00390625, %v152_v7 }
  0xb1   :  { %v193_v51 = vmul.f32 0.00390625, %v104_v46  ;;  %v384_v46 = vrot.slane %v206_v62, %v1337_v13 }
  0xb2   :  { %v398_v35 = vrot.slane %v209_v45, %v1346_v52  ;;  %v1397_v45 = vsub.s32 %v374_v53, %v1330_v31 }
  0xb3   :  { %v155_v61 = vpop.xlane.xlu1 %154  ;;  %v294_v56 = vrot.slane %v193_v51, %v1346_v52  ;;  %v389_v23 = vsel %vm281_vm1, %v388_v59, %v384_v46 }
  0xb4   :  { %v107_v60 = vpop.xlane.xlu0 %106  ;;  %v210_v50 = vmul.f32 0.00390625, %v155_v61  ;;  %v287_v61 = vrot.slane %v192_v40, %v1341_v1  ;;  %v394_v13 = vsel %vm288_vm2, %v393_v11, %v389_v23 }
  0xb5   :  { %v194_v10 = vmul.f32 0.00390625, %v107_v60 }
  0xb7   :  { %v158_v43 = vpop.xlane.xlu1 %157  ;;  %v301_v62 = vrot.slane %v194_v10, %v1349_v28 }
  0xb8   :  { %v1320_v42 = vpop.xlane.xlu0 %109  ;;  %v211_v33 = vmul.f32 0.00390625, %v158_v43 }
  0xb9   :  { %v195_v7 = vmul.f32 0.00390625, %v1320_v42  ;;  %v403_v42 = vrot.slane %v210_v50, %v1349_v28  ;;  %v399_v28 = vsel %vm295_vm3, %v398_v35, %v394_v13 }
  0xba   :  { %v408_v1 = vrot.slane %v211_v33, %v1354_v30 }
  0xbb   :  { %v1322_v47 = vpop.xlane.xlu1 %160  ;;  %v308_v51 = vrot.slane %v195_v7, %v1354_v30  ;;  %v404_v5 = vsel %vm302_vm4, %v403_v42, %v399_v28 }
  0xbc   :  { %v1324_v3 = vpop.xlane.xlu0 %112  ;;  %v212_v34 = vmul.f32 0.00390625, %v1322_v47  ;;  %v282_v47 = vsel %vm281_vm1, %v280_v32, %v275_v48  ;;  %v409_v54 = vsel %vm309_vm5, %v408_v1, %v404_v5  ;;  %vm535_vm1 = vcmask 64512  }
  0xbd   :  { %v196_v60 = vmul.f32 0.00390625, %v1324_v3  ;;  %v289_v3 = vsel %vm288_vm2, %v287_v61, %v282_v47 }
  0xbe   :  { %v413_v33 = vrot.slane %v212_v34, %v1357_v37  ;;  %v296_v32 = vsel %vm295_vm3, %v294_v56, %v289_v3 }
  0xbf   :  { %v1326_v49 = vpop.xlane.xlu1 %163  ;;  %v315_v30 = vrot.slane %v196_v60, %v1357_v37  ;;  %v303_v40 = vsel %vm302_vm4, %v301_v62, %v296_v32 }
  0xc0   :  { %v1328_v41 = vpop.xlane.xlu0 %115  ;;  %v213_v50 = vmul.f32 0.00390625, %v1326_v49 }
  0xc1   :  { %v197_v22 = vmul.f32 0.00390625, %v1328_v41  ;;  %v310_v41 = vsel %vm309_vm5, %v308_v51, %v303_v40 }
  0xc2   :  { %v418_v53 = vrot.slane %v213_v50, %v1360_v16 }
  0xc3   :  { %v1332_v36 = vpop.xlane.xlu1 %166  ;;  %v322_v46 = vrot.slane %v197_v22, %v1360_v16 }
  0xc4   :  { %v1334_v25 = vpop.xlane.xlu0 %118  ;;  %v214_v49 = vmul.f32 0.00390625, %v1332_v36  ;;  %v414_v36 = vsel %vm316_vm6, %v413_v33, %v409_v54 }
  0xc5   :  { %v198_v59 = vmul.f32 0.00390625, %v1334_v25  ;;  %v419_v23 = vsel %vm323_vm7, %v418_v53, %v414_v36 }
  0xc6   :  { %v423_v25 = vrot.slane %v214_v49, %v1363_v19 }
  0xc7   :  { %v1343_v0 = vpop.xlane.xlu1 %169  ;;  %v329_v42 = vrot.slane %v198_v59, %v1363_v19 }
  0xc8   :  { %v1351_v29 = vpop.xlane.xlu0 %121  ;;  %v215_v10 = vmul.f32 0.00390625, %v1343_v0  ;;  %v317_v0 = vsel %vm316_vm6, %v315_v30, %v310_v41  ;;  %v424_v51 = vsel %vm330_vm8, %v423_v25, %v419_v23 }
  0xc9   :  { %v199_v11 = vmul.f32 0.00390625, %v1351_v29  ;;  %v324_v1 = vsel %vm323_vm7, %v322_v46, %v317_v0 }
  0xca   :  { %v428_v29 = vrot.slane %v215_v10, %v1366_v18 }
  0xcb   :  { %v173_v6 = vpop.xlane.xlu1 %172  ;;  %v336_v16 = vrot.slane %v199_v11, %v1366_v18  ;;  %v331_v18 = vsel %vm330_vm8, %v329_v42, %v324_v1 }
  0xcc   :  { %v125_v44 = vpop.xlane.xlu0 %124  ;;  %v216_v7 = vmul.f32 0.00390625, %v173_v6  ;;  %v429_v28 = vsel %vm337_vm9, %v428_v29, %v424_v51 }
  0xcd   :  { %v200_v61 = vmul.f32 0.00390625, %v125_v44 }
  0xce   :  { %v433_v44 = vrot.slane %v216_v7, %v1369_v57 }
  0xcf   :  { %v176_v58 = vpop.xlane.xlu1 %175  ;;  %v343_v47 = vrot.slane %v200_v61, %v1369_v57  ;;  %v338_v57 = vsel %vm337_vm9, %v336_v16, %v331_v18 }
  0xd0   :  { %v128_v43 = vpop.xlane.xlu0 %127  ;;  %v217_v35 = vmul.f32 0.00390625, %v176_v58 }
  0xd1   :  { %v201_v48 = vmul.f32 0.00390625, %v128_v43  ;;  %v345_v30 = vsel %vm344_vm10, %v343_v47, %v338_v57 }
  0xd2   :  { %v438_v43 = vrot.slane %v217_v35, %v1372_v63 }
  0xd3   :  { %v179_v52 = vpop.xlane.xlu1 %178  ;;  %v350_v50 = vrot.slane %v201_v48, %v1372_v63 }
  0xd4   :  { %v131_v24 = vpop.xlane.xlu0 %130  ;;  %v218_v56 = vmul.f32 0.00390625, %v179_v52 }
  0xd5   :  { %v202_v6 = vmul.f32 0.00390625, %v131_v24  ;;  %v434_v24 = vsel %vm344_vm10, %v433_v44, %v429_v28  ;;  %v684_v44 = vsub.s32 1, %v1330_v31 }
  0xd6   :  { %v443_v52 = vrot.slane %v218_v56, %v1375_v12  ;;  %v439_v49 = vsel %vm351_vm11, %v438_v43, %v434_v24  ;;  %v1647_v24 = vld [vmem:[#allocation30_spill] sm:$0xff] }
  0xd7   :  { %v182_v37 = vpop.xlane.xlu1 %181  ;;  %v357_v33 = vrot.slane %v202_v6, %v1375_v12  ;;  %v352_v12 = vsel %vm351_vm11, %v350_v50, %v345_v30  ;;  %v1650_v30 = vld [vmem:[#allocation27_spill] sm:$0xff] }
  0xd8   :  { %v134_v34 = vpop.xlane.xlu0 %133  ;;  %v219_v60 = vmul.f32 0.00390625, %v182_v37  ;;  %v444_v10 = vsel %vm358_vm12, %v443_v52, %v439_v49 }
  0xd9   :  { %v203_v58 = vmul.f32 0.00390625, %v134_v34  ;;  %v359_v53 = vsel %vm358_vm12, %v357_v33, %v352_v12  ;;  %v534_v34 = vld [vmem:[%s1539_s2] sm:$0xff]  ;;  %s1044_s2 = smov [#allocation5]  }
  0xda   :  { %v448_v22 = vrot.slane %v219_v60, %v1378_v55  ;;  %951 = vmatpush3.msra.mxu1 %v534_v34  ;;  %v617_v60 = vsub.s32 0, %v1330_v31  ;;  %v1657_v34 = vld [vmem:[#allocation42_spill] sm:$0xff]  ;;  %s882_s5 = sshll.u32 %s1044_s2, 4  ;;  %s883_s5 = int_to_ptr.vmem [resolvable:$true] %s882_s5 }
  0xdb   :  { %v185_v62 = vpop.xlane.xlu1 %184  ;;  %v364_v32 = vrot.slane %v203_v58, %v1378_v55  ;;  %s1012_s6 = scalar_lea.vmem %s883_s5, 8192  ;;  %p1017_p9 = scmp.lt.s32.totalorder %s883_s5, %s883_s5 }
  0xdc   :  { %v220_v13 = vmul.f32 0.00390625, %v185_v62  ;;  %v137_v19 = vpop.xlane.xlu0 %136  ;;  %v449_v55 = vsel %vm365_vm13, %v448_v22, %v444_v10  ;;  %v1646_v22 = vld [vmem:[#allocation21_spill] sm:$0xff]  ;;  %p1013_p8 = scmp.ne.s32.totalorder %s883_s5, %s1012_s6  ;;  %p1018_p10 = scmp.lt.s32.totalorder %s1012_s6, %s1012_s6 }
  0xdd   :  { %v204_v3 = vmul.f32 0.00390625, %v137_v19  ;;  %v366_v7 = vsel %vm365_vm13, %v364_v32, %v359_v53  ;;  %v1653_v53 = vld [vmem:[#allocation34_spill] sm:$0xff] }
  0xde   :  { %v453_v5 = vrot.slane %v220_v13, %v1383_v17  ;;  %p1019_p11 = por %p1018_p10, %p1017_p9 }
  0xdf   :  { %v188_v63 = vpop.xlane.xlu1 %187  ;;  %v371_v40 = vrot.slane %v204_v3, %v1383_v17 }
  0xe0   :  { %v221_v54 = vmul.f32 0.00390625, %v188_v63  ;;  %v140_v59 = vpop.xlane.xlu0 %139  ;;  %v454_v17 = vsel %vm372_vm14, %v453_v5, %v449_v55  ;;  %v1648_v5 = vld [vmem:[#allocation31_spill] sm:$0xff]  ;;  %p1020_p12 = pnand %p1019_p11, %p1013_p8 }
  0xe1   :  { %v205_v41 = vmul.f32 0.00390625, %v140_v59  ;;  %v373_v36 = vsel %vm372_vm14, %v371_v40, %v366_v7  ;;  %v1651_v40 = vld [vmem:[#allocation38_spill] sm:$0xff]  ;;  %v1652_v59 = vld [vmem:[#allocation39_spill] sm:$0xff] }
  0xe2   :  { %v458_v11 = vrot.slane %v221_v54, %v1397_v45 }
  0xe3   :  { %v378_v37 = vrot.slane %v205_v41, %v1397_v45 }
  0xe4   :  { %v459_v46 = vsel %vm379_vm15, %v458_v11, %v454_v17  ;;  %v1654_v11 = vld [vmem:[#allocation35_spill] sm:$0xff] }
  0xe5   :  { %v380_v61 = vsel %vm379_vm15, %v378_v37, %v373_v36  ;;  %v1655_v37 = vld [vmem:[#allocation46_spill] sm:$0xff]  ;;  %v1656_v36 = vld [vmem:[#allocation47_spill] sm:$0xff] }
  0xe6   :  { %v461_v35 = vsel %vm460_vm0, %v459_v46, %v380_v61 }
  0xe7   :  { %948 = vmatmul.mubr.f32.vlgmr.msra.gmra.mrb[0].mxu0 %v461_v35 }
 0x1ba   :  { %v529_v0 = vpop.f32.mrb[0].mxu0 }
 0x1bb   :  { %v533_v25 = vmax.f32 %v529_v0, 0.0  ;;  %v949_v48 = vpop.f32.mrb[1].mxu0 }
 0x1bd   :  { %953 = vmatmul.mubr.msk.f32.vlgmr.msra.gmra.mrb[0].mxu1 %vm535_vm1, %v533_v25  ;;  %v1658_v25 = vld [vmem:[#allocation43_spill] sm:$0xff] }
 0x290   :  { %v605_v45 = vpop.f32.mrb[0].mxu1 }
 0x291   :  { %v895_v56 = vmul.f32 -1.442695, %v605_v45  ;;  %v954_v42 = vpop.f32.mrb[1].mxu1  ;;  %v1659_v45 = vld [vmem:[#allocation54_spill] sm:$0xff] }
 0x292   :  { %v1660_v42 = vld [vmem:[#allocation55_spill] sm:$0xff] }
 0x293   :  { %986 = vpow2.f32 %v895_v56 }
 0x29d   :  { %v987_v29 = vpop.eup %986 }
 0x29e   :  { %v612_v6 = vadd.f32 1.0, %v987_v29 }
 0x2a0   :  { %988 = vrcp.f32 %v612_v6 }
 0x2aa   :  { %v989_v23 = vpop.eup %988 }
 0x2ab   :  { %v618_v16 = vrot.slane %v989_v23, %v617_v60  ;;  %v685_v58 = vrot.slane %v989_v23, %v684_v44  ;;  %v1661_v23 = vld [vmem:[#allocation50_spill] sm:$0xff]  ;;  %v1662_v44 = vld [vmem:[#allocation51_spill] sm:$0xff] }
 0x2ad   :  { %624 = vbcast.lane.b32.xlu1 %v618_v16, 264  ;;  %620 = vbcast.lane.b32.xlu0 %v618_v16, 256 }
 0x2b1   :  { %628 = vbcast.lane.b32.xlu1 %v618_v16, 272  ;;  %636 = vbcast.lane.b32.xlu0 %v618_v16, 288 }
 0x2b5   :  { %632 = vbcast.lane.b32.xlu1 %v618_v16, 280  ;;  %644 = vbcast.lane.b32.xlu0 %v618_v16, 304 }
 0x2b9   :  { %640 = vbcast.lane.b32.xlu1 %v618_v16, 296  ;;  %652 = vbcast.lane.b32.xlu0 %v618_v16, 320 }
 0x2bd   :  { %648 = vbcast.lane.b32.xlu1 %v618_v16, 312  ;;  %660 = vbcast.lane.b32.xlu0 %v618_v16, 336 }
 0x2c1   :  { %656 = vbcast.lane.b32.xlu1 %v618_v16, 328  ;;  %668 = vbcast.lane.b32.xlu0 %v618_v16, 352 }
 0x2c5   :  { %664 = vbcast.lane.b32.xlu1 %v618_v16, 344  ;;  %676 = vbcast.lane.b32.xlu0 %v618_v16, 368 }
 0x2c9   :  { %672 = vbcast.lane.b32.xlu1 %v618_v16, 360  ;;  %687 = vbcast.lane.b32.xlu0 %v685_v58, 256 }
 0x2cd   :  { %680 = vbcast.lane.b32.xlu1 %v618_v16, 376  ;;  %695 = vbcast.lane.b32.xlu0 %v685_v58, 272 }
 0x2d1   :  { %691 = vbcast.lane.b32.xlu1 %v685_v58, 264  ;;  %703 = vbcast.lane.b32.xlu0 %v685_v58, 288 }
 0x2d5   :  { %699 = vbcast.lane.b32.xlu1 %v685_v58, 280  ;;  %711 = vbcast.lane.b32.xlu0 %v685_v58, 304 }
 0x2d9   :  { %707 = vbcast.lane.b32.xlu1 %v685_v58, 296  ;;  %719 = vbcast.lane.b32.xlu0 %v685_v58, 320 }
 0x2dd   :  { %715 = vbcast.lane.b32.xlu1 %v685_v58, 312  ;;  %727 = vbcast.lane.b32.xlu0 %v685_v58, 336 }
 0x2e1   :  { %723 = vbcast.lane.b32.xlu1 %v685_v58, 328  ;;  %735 = vbcast.lane.b32.xlu0 %v685_v58, 352 }
 0x2e5   :  { %731 = vbcast.lane.b32.xlu1 %v685_v58, 344  ;;  %743 = vbcast.lane.b32.xlu0 %v685_v58, 368 }
 0x2e9   :  { %739 = vbcast.lane.b32.xlu1 %v685_v58, 360 }
 0x2ed   :  { %747 = vbcast.lane.b32.xlu1 %v685_v58, 376 }
 0x31f   :  { %v625_v31 = vpop.permute.xlu1 %624  ;;  %v621_v62 = vpop.permute.xlu0 %620 }
 0x320   :  { %v751_v1 = vmul.f32 %v625_v31, %v1096_v8  ;;  %v752_v47 = vmul.f32 %v625_v31, %v1098_v9  ;;  %v749_v43 = vmul.f32 %v621_v62, %v1084_v2  ;;  %v750_v13 = vmul.f32 %v621_v62, %v1088_v4  ;;  %v1663_v31 = vld [vmem:[#allocation8_spill] sm:$0xff] }
 0x322   :  { %815 = vst [vmem:[#allocation5 + $0x10] sm:$0xff] %v751_v1  ;;  %816 = vst [vmem:[#allocation5 + $0x18] sm:$0xff] %v752_v47  ;;  %v1664_v1 = vld [vmem:[#allocation9_spill] sm:$0xff] }
 0x323   :  { %813 = vst [vmem:[#allocation5] sm:$0xff] %v749_v43  ;;  %814 = vst [vmem:[#allocation5 + $0x8] sm:$0xff] %v750_v13  ;;  %v629_v19 = vpop.permute.xlu1 %628  ;;  %v637_v51 = vpop.permute.xlu0 %636 }
 0x324   :  { %v753_v50 = vmul.f32 %v629_v19, %v1108_v14  ;;  %v754_v52 = vmul.f32 %v629_v19, %v1110_v15  ;;  %v757_v3 = vmul.f32 %v637_v51, %v1132_v26  ;;  %v758_v8 = vmul.f32 %v637_v51, %v1134_v27  ;;  %v1645_v27 = vld [vmem:[#allocation20_spill] sm:$0xff]  ;;  %v1665_v19 = vld [vmem:[#allocation58_spill] sm:$0xff] }
 0x326   :  { %817 = vst [vmem:[#allocation5 + $0x20] sm:$0xff] %v753_v50  ;;  %818 = vst [vmem:[#allocation5 + $0x28] sm:$0xff] %v754_v52  ;;  %v1666_v50 = vld [vmem:[#allocation59_spill] sm:$0xff] }
 0x327   :  { %821 = vst [vmem:[#allocation5 + $0x40] sm:$0xff] %v757_v3  ;;  %822 = vst [vmem:[#allocation5 + $0x48] sm:$0xff] %v758_v8  ;;  %v633_v2 = vpop.permute.xlu1 %632  ;;  %v645_v4 = vpop.permute.xlu0 %644  ;;  %v1667_v3 = vld [vmem:[#allocation12_spill] sm:$0xff] }
 0x328   :  { %v755_v9 = vmul.f32 %v633_v2, %v1120_v20  ;;  %v756_v18 = vmul.f32 %v633_v2, %v1122_v21  ;;  %v761_v28 = vmul.f32 %v645_v4, %v1156_v38  ;;  %v762_v14 = vmul.f32 %v645_v4, %v1158_v39  ;;  %v1649_v39 = vld [vmem:[#allocation26_spill] sm:$0xff]  ;;  %v1668_v2 = vld [vmem:[#allocation13_spill] sm:$0xff] }
 0x32a   :  { %819 = vst [vmem:[#allocation5 + $0x30] sm:$0xff] %v755_v9  ;;  %820 = vst [vmem:[#allocation5 + $0x38] sm:$0xff] %v756_v18 }
 0x32b   :  { %825 = vst [vmem:[#allocation5 + $0x60] sm:$0xff] %v761_v28  ;;  %826 = vst [vmem:[#allocation5 + $0x68] sm:$0xff] %v762_v14  ;;  %v641_v15 = vpop.permute.xlu1 %640  ;;  %v653_v26 = vpop.permute.xlu0 %652  ;;  %v1669_v28 = vld [vmem:[#allocation10_spill] sm:$0xff] }
 0x32c   :  { %v759_v33 = vmul.f32 %v641_v15, %v1645_v27  ;;  %v760_v57 = vmul.f32 %v641_v15, %v1646_v22  ;;  %v765_v32 = vmul.f32 %v653_v26, %v1647_v24  ;;  %v766_v20 = vmul.f32 %v653_v26, %v1648_v5  ;;  %v1670_v15 = vld [vmem:[#allocation11_spill] sm:$0xff]  ;;  %v1671_v27 = vld [vmem:[#allocation16_spill] sm:$0xff]  ;;  %v1672_v22 = vld [vmem:[#allocation17_spill] sm:$0xff] }
 0x32d   :  { %v1673_v5 = vld [vmem:[#allocation14_spill] sm:$0xff] }
 0x32e   :  { %823 = vst [vmem:[#allocation5 + $0x50] sm:$0xff] %v759_v33  ;;  %824 = vst [vmem:[#allocation5 + $0x58] sm:$0xff] %v760_v57 }
 0x32f   :  { %829 = vst [vmem:[#allocation5 + $0x80] sm:$0xff] %v765_v32  ;;  %830 = vst [vmem:[#allocation5 + $0x88] sm:$0xff] %v766_v20  ;;  %v649_v21 = vpop.permute.xlu1 %648  ;;  %v661_v38 = vpop.permute.xlu0 %660 }
 0x330   :  { %v763_v63 = vmul.f32 %v649_v21, %v1649_v39  ;;  %v764_v49 = vmul.f32 %v649_v21, %v1650_v30  ;;  %v769_v54 = vmul.f32 %v661_v38, %v1651_v40  ;;  %v770_v12 = vmul.f32 %v661_v38, %v1652_v59  ;;  %v1674_v21 = vld [vmem:[#allocation15_spill] sm:$0xff]  ;;  %v1675_v39 = vld [vmem:[#allocation22_spill] sm:$0xff] }
 0x331   :  { %v1676_v30 = vld [vmem:[#allocation23_spill] sm:$0xff]  ;;  %v1677_v59 = vld [vmem:[#allocation18_spill] sm:$0xff] }
 0x332   :  { %827 = vst [vmem:[#allocation5 + $0x70] sm:$0xff] %v763_v63  ;;  %828 = vst [vmem:[#allocation5 + $0x78] sm:$0xff] %v764_v49 }
 0x333   :  { %833 = vst [vmem:[#allocation5 + $0xa0] sm:$0xff] %v769_v54  ;;  %834 = vst [vmem:[#allocation5 + $0xa8] sm:$0xff] %v770_v12  ;;  %v657_v10 = vpop.permute.xlu1 %656  ;;  %v669_v41 = vpop.permute.xlu0 %668 }
 0x334   :  { %v767_v55 = vmul.f32 %v657_v10, %v1653_v53  ;;  %v768_v7 = vmul.f32 %v657_v10, %v1654_v11  ;;  %v773_v17 = vmul.f32 %v669_v41, %v1655_v37  ;;  %v774_v46 = vmul.f32 %v669_v41, %v1656_v36  ;;  %v1678_v10 = vld [vmem:[#allocation19_spill] sm:$0xff]  ;;  %v1679_v53 = vld [vmem:[#allocation28_spill] sm:$0xff]  ;;  %v1680_v11 = vld [vmem:[#allocation29_spill] sm:$0xff] }
 0x335   :  { %v1681_v36 = vld [vmem:[#allocation24_spill] sm:$0xff] }
 0x336   :  { %831 = vst [vmem:[#allocation5 + $0x90] sm:$0xff] %v767_v55  ;;  %832 = vst [vmem:[#allocation5 + $0x98] sm:$0xff] %v768_v7 }
 0x337   :  { %837 = vst [vmem:[#allocation5 + $0xc0] sm:$0xff] %v773_v17  ;;  %838 = vst [vmem:[#allocation5 + $0xc8] sm:$0xff] %v774_v46  ;;  %v665_v61 = vpop.permute.xlu1 %664  ;;  %v677_v35 = vpop.permute.xlu0 %676 }
 0x338   :  { %v771_v0 = vmul.f32 %v665_v61, %v1657_v34  ;;  %v772_v48 = vmul.f32 %v665_v61, %v1658_v25  ;;  %v777_v56 = vmul.f32 %v677_v35, %v1659_v45  ;;  %v778_v29 = vmul.f32 %v677_v35, %v1660_v42  ;;  %v1682_v61 = vld [vmem:[#allocation25_spill] sm:$0xff]  ;;  %v1683_v34 = vld [vmem:[#allocation36_spill] sm:$0xff] }
 0x339   :  { %v1684_v25 = vld [vmem:[#allocation37_spill] sm:$0xff]  ;;  %v1685_v42 = vld [vmem:[#allocation32_spill] sm:$0xff] }
 0x33a   :  { %835 = vst [vmem:[#allocation5 + $0xb0] sm:$0xff] %v771_v0  ;;  %836 = vst [vmem:[#allocation5 + $0xb8] sm:$0xff] %v772_v48 }
 0x33b   :  { %841 = vst [vmem:[#allocation5 + $0xe0] sm:$0xff] %v777_v56  ;;  %842 = vst [vmem:[#allocation5 + $0xe8] sm:$0xff] %v778_v29  ;;  %v673_v6 = vpop.permute.xlu1 %672  ;;  %v688_v60 = vpop.permute.xlu0 %687 }
 0x33c   :  { %v775_v16 = vmul.f32 %v673_v6, %v1661_v23  ;;  %v776_v58 = vmul.f32 %v673_v6, %v1662_v44  ;;  %v781_v62 = vmul.f32 %v688_v60, %v1663_v31  ;;  %v782_v47 = vmul.f32 %v688_v60, %v1664_v1  ;;  %v1686_v6 = vld [vmem:[#allocation33_spill] sm:$0xff]  ;;  %v1687_v23 = vld [vmem:[#allocation44_spill] sm:$0xff] }
 0x33d   :  { %v1688_v44 = vld [vmem:[#allocation45_spill] sm:$0xff]  ;;  %v1689_v1 = vld [vmem:[#allocation40_spill] sm:$0xff] }
 0x33e   :  { %839 = vst [vmem:[#allocation5 + $0xd0] sm:$0xff] %v775_v16  ;;  %840 = vst [vmem:[#allocation5 + $0xd8] sm:$0xff] %v776_v58 }
 0x33f   :  { %845 = vst [vmem:[#allocation5 + $0x100] sm:$0xff] %v781_v62  ;;  %846 = vst [vmem:[#allocation5 + $0x108] sm:$0xff] %v782_v47  ;;  %v681_v43 = vpop.permute.xlu1 %680  ;;  %v696_v13 = vpop.permute.xlu0 %695 }
 0x340   :  { %v779_v51 = vmul.f32 %v681_v43, %v1665_v19  ;;  %v780_v52 = vmul.f32 %v681_v43, %v1666_v50  ;;  %v785_v8 = vmul.f32 %v696_v13, %v1667_v3  ;;  %v786_v4 = vmul.f32 %v696_v13, %v1668_v2  ;;  %v1690_v43 = vld [vmem:[#allocation41_spill] sm:$0xff]  ;;  %v1691_v19 = vld [vmem:[#allocation52_spill] sm:$0xff] }
 0x341   :  { %v1692_v50 = vld [vmem:[#allocation53_spill] sm:$0xff] }
 0x342   :  { %843 = vst [vmem:[#allocation5 + $0xf0] sm:$0xff] %v779_v51  ;;  %844 = vst [vmem:[#allocation5 + $0xf8] sm:$0xff] %v780_v52 }
 0x343   :  { %849 = vst [vmem:[#allocation5 + $0x120] sm:$0xff] %v785_v8  ;;  %850 = vst [vmem:[#allocation5 + $0x128] sm:$0xff] %v786_v4  ;;  %v692_v9 = vpop.permute.xlu1 %691  ;;  %v704_v18 = vpop.permute.xlu0 %703  ;;  %v1693_v8 = vld [vmem:[#allocation48_spill] sm:$0xff]  ;;  %v1694_v4 = vld [vmem:[#allocation49_spill] sm:$0xff] }
 0x344   :  { %v783_v14 = vmul.f32 %v692_v9, %v1669_v28  ;;  %v784_v26 = vmul.f32 %v692_v9, %v1670_v15  ;;  %v789_v33 = vmul.f32 %v704_v18, %v1671_v27  ;;  %v790_v57 = vmul.f32 %v704_v18, %v1672_v22  ;;  %v1695_v28 = vld [vmem:[#allocation56_spill] sm:$0xff]  ;;  %v1696_v15 = vld [vmem:[#allocation57_spill] sm:$0xff] }
 0x346   :  { %847 = vst [vmem:[#allocation5 + $0x110] sm:$0xff] %v783_v14  ;;  %848 = vst [vmem:[#allocation5 + $0x118] sm:$0xff] %v784_v26 }
 0x347   :  { %853 = vst [vmem:[#allocation5 + $0x140] sm:$0xff] %v789_v33  ;;  %854 = vst [vmem:[#allocation5 + $0x148] sm:$0xff] %v790_v57  ;;  %v700_v24 = vpop.permute.xlu1 %699  ;;  %v712_v32 = vpop.permute.xlu0 %711 }
 0x348   :  { %v787_v20 = vmul.f32 %v700_v24, %v1673_v5  ;;  %v788_v38 = vmul.f32 %v700_v24, %v1674_v21  ;;  %v793_v63 = vmul.f32 %v712_v32, %v1675_v39  ;;  %v794_v49 = vmul.f32 %v712_v32, %v1676_v30 }
 0x34a   :  { %851 = vst [vmem:[#allocation5 + $0x130] sm:$0xff] %v787_v20  ;;  %852 = vst [vmem:[#allocation5 + $0x138] sm:$0xff] %v788_v38 }
 0x34b   :  { %857 = vst [vmem:[#allocation5 + $0x160] sm:$0xff] %v793_v63  ;;  %858 = vst [vmem:[#allocation5 + $0x168] sm:$0xff] %v794_v49  ;;  %v708_v40 = vpop.permute.xlu1 %707  ;;  %v720_v54 = vpop.permute.xlu0 %719 }
 0x34c   :  { %v791_v12 = vmul.f32 %v708_v40, %v1677_v59  ;;  %v792_v41 = vmul.f32 %v708_v40, %v1678_v10  ;;  %v797_v55 = vmul.f32 %v720_v54, %v1679_v53  ;;  %v798_v7 = vmul.f32 %v720_v54, %v1680_v11 }
 0x34e   :  { %855 = vst [vmem:[#allocation5 + $0x150] sm:$0xff] %v791_v12  ;;  %856 = vst [vmem:[#allocation5 + $0x158] sm:$0xff] %v792_v41 }
 0x34f   :  { %861 = vst [vmem:[#allocation5 + $0x180] sm:$0xff] %v797_v55  ;;  %862 = vst [vmem:[#allocation5 + $0x188] sm:$0xff] %v798_v7  ;;  %v716_v37 = vpop.permute.xlu1 %715  ;;  %v728_v17 = vpop.permute.xlu0 %727 }
 0x350   :  { %v795_v46 = vmul.f32 %v716_v37, %v1681_v36  ;;  %v796_v35 = vmul.f32 %v716_v37, %v1682_v61  ;;  %v801_v0 = vmul.f32 %v728_v17, %v1683_v34  ;;  %v802_v48 = vmul.f32 %v728_v17, %v1684_v25 }
 0x352   :  { %859 = vst [vmem:[#allocation5 + $0x170] sm:$0xff] %v795_v46  ;;  %860 = vst [vmem:[#allocation5 + $0x178] sm:$0xff] %v796_v35 }
 0x353   :  { %865 = vst [vmem:[#allocation5 + $0x1a0] sm:$0xff] %v801_v0  ;;  %866 = vst [vmem:[#allocation5 + $0x1a8] sm:$0xff] %v802_v48  ;;  %v724_v45 = vpop.permute.xlu1 %723  ;;  %v736_v56 = vpop.permute.xlu0 %735 }
 0x354   :  { %v799_v29 = vmul.f32 %v724_v45, %v1685_v42  ;;  %v800_v60 = vmul.f32 %v724_v45, %v1686_v6  ;;  %v805_v16 = vmul.f32 %v736_v56, %v1687_v23  ;;  %v806_v58 = vmul.f32 %v736_v56, %v1688_v44 }
 0x356   :  { %863 = vst [vmem:[#allocation5 + $0x190] sm:$0xff] %v799_v29  ;;  %864 = vst [vmem:[#allocation5 + $0x198] sm:$0xff] %v800_v60 }
 0x357   :  { %869 = vst [vmem:[#allocation5 + $0x1c0] sm:$0xff] %v805_v16  ;;  %870 = vst [vmem:[#allocation5 + $0x1c8] sm:$0xff] %v806_v58  ;;  %v732_v31 = vpop.permute.xlu1 %731  ;;  %v744_v62 = vpop.permute.xlu0 %743 }
 0x358   :  { %v803_v47 = vmul.f32 %v732_v31, %v1689_v1  ;;  %v804_v13 = vmul.f32 %v732_v31, %v1690_v43  ;;  %v809_v51 = vmul.f32 %v744_v62, %v1691_v19  ;;  %v810_v52 = vmul.f32 %v744_v62, %v1692_v50 }
 0x35a   :  { %867 = vst [vmem:[#allocation5 + $0x1b0] sm:$0xff] %v803_v47  ;;  %868 = vst [vmem:[#allocation5 + $0x1b8] sm:$0xff] %v804_v13 }
 0x35b   :  { %873 = vst [vmem:[#allocation5 + $0x1e0] sm:$0xff] %v809_v51  ;;  %874 = vst [vmem:[#allocation5 + $0x1e8] sm:$0xff] %v810_v52  ;;  %v740_v3 = vpop.permute.xlu1 %739 }
 0x35c   :  { %v807_v2 = vmul.f32 %v740_v3, %v1693_v8  ;;  %v808_v9 = vmul.f32 %v740_v3, %v1694_v4 }
 0x35e   :  { %871 = vst [vmem:[#allocation5 + $0x1d0] sm:$0xff] %v807_v2  ;;  %872 = vst [vmem:[#allocation5 + $0x1d8] sm:$0xff] %v808_v9 }
 0x35f   :  { %v748_v18 = vpop.permute.xlu1 %747 }
 0x360   :  { %v811_v14 = vmul.f32 %v748_v18, %v1695_v28  ;;  %v812_v26 = vmul.f32 %v748_v18, %v1696_v15 }
 0x362   :  { %875 = vst [vmem:[#allocation5 + $0x1f0] sm:$0xff] %v811_v14  ;;  %876 = vst [vmem:[#allocation5 + $0x1f8] sm:$0xff] %v812_v26 }
 0x363   :  { %1023 = shalt.err (!%p1020_p12)
}
 0x364   :  { %s1024_s9 = scalar_lea.hbm %s1540_s3, 8192 }
 0x365   :  { %p1025_p13 = scmp.ne.s32.totalorder %s1540_s3, %s1024_s9  ;;  %p1028_p0 = scmp.lt.u32.totalorder %s1024_s9, %s1540_s3 }
 0x367   :  { %p1030_p1 = pnand %p1028_p0, %p1025_p13 }
 0x369   :  { %1033 = shalt.err (!%p1030_p1)
}
 0x36a   :  { %888 = dma.vmem_to_hbm [thread:$0]  %s883_s5, 8192, %s1540_s3, [#allocation4], %s1039_s22, %s1039_s22, %s1040_s23  }
 0x36b   :  { %1036 = dma.done.wait [#allocation4], 8192  }
 0x36c   :  { %1037 = vsyncadd [#allocation4], 4294959104 }
 0x36d   :  { %892 = vsyncpa [#allocation3], 1 }
 0x36e   :  { %893 = vsyncpa [#allocation4], 1 }

</bundles_post_ra>
